<compile_context>
chip_gen: v7x
topology: tpu7x:2x2x1
jax: 0.10.0
libtpu: 0.0.40
codegen_flags: <defaults>
</compile_context>

<pallas_src>
import functools

import jax
import jax.numpy as jnp
from jax.experimental import pallas as pl
from jax.experimental.pallas import tpu as pltpu

LANE = 128


def _softplus(x):
    # Numerically stable softplus: max(x, 0) + log1p(exp(-|x|))
    return jnp.maximum(x, 0.0) + jnp.log1p(jnp.exp(-jnp.abs(x)))


def _tmsu_kernel(wb_ref, x_ref, *out_refs, n_in, n_cls, with_alpha):
    """One (batch, spatial-row-tile) block of the TMSU forward.

    wb_ref:    (n_in*n_cls + n_cls,) SMEM f32 — flattened 1x1-conv weight
               (row-major [c, k]) followed by the bias, read as scalars.
    x_ref:     (n_in,  TILE_R, 128) VMEM — per-channel dense spatial slabs.
    out_refs:  evidence (n_cls, TILE_R, 128) and optionally alpha (same shape).
    """
    ev_ref = out_refs[0]
    alpha_ref = out_refs[1] if with_alpha else None

    # Load each channel slab once; each is a full (TILE_R, 128) lane-dense tile.
    xs = [x_ref[c].astype(jnp.float32) for c in range(n_in)]

    for k in range(n_cls):                               # classes: tiny static loop
        acc = xs[0] * wb_ref[k]                          # (TILE_R, 128) VPU FMAs
        for c in range(1, n_in):
            acc = acc + xs[c] * wb_ref[c * n_cls + k]
        logits = acc + wb_ref[n_in * n_cls + k]          # + bias[k]
        ev = _softplus(logits)
        ev_ref[k] = ev.astype(ev_ref.dtype)              # direct per-class store
        if with_alpha:
            alpha_ref[k] = (ev + 1.0).astype(alpha_ref.dtype)


@functools.partial(
    jax.jit, static_argnames=("max_tile_r", "compute_alpha", "out_dtype")
)
def tmsu_forward(x_nchw, weight, bias, *, max_tile_r=512, compute_alpha=True,
                 out_dtype=None):
    """TMSU forward: evidence = softplus(backbone(X)), alpha = evidence + 1.

    x_nchw:  [B, C_in, H, W]
    weight:  [C_in, classes]   (1x1-conv stand-in for the backbone)
    bias:    [classes]
    returns: (evidence [B, classes, H, W], alpha [...]) or evidence only.
    Pass bf16 inputs / out_dtype=jnp.bfloat16 to halve HBM bytes; the kernel
    always accumulates in f32.
    """
    B, C, H, W = x_nchw.shape
    n_cls = weight.shape[1]
    out_dtype = x_nchw.dtype if out_dtype is None else out_dtype

    # ---- tiling over the flattened spatial axis, viewed as (rows, 128) ----
    S = H * W
    R_raw = -(-S // LANE)                     # rows of 128 lanes needed
    if R_raw <= max_tile_r:
        tile_r = R_raw                        # single full-extent spatial tile
    else:
        tile_r = max(8, (max_tile_r // 8) * 8)  # partial tiles: multiple of 8
    n_row_tiles = -(-R_raw // tile_r)

    # v7x: make sure there are >= 2 grid steps so both TensorCores get work.
    if B * n_row_tiles < 2 and R_raw >= 16:
        tile_r = (((R_raw + 1) // 2) + 7) // 8 * 8
        n_row_tiles = -(-R_raw // tile_r)

    R = n_row_tiles * tile_r
    Sp = R * LANE

    # ---- layout: reshape only (no transpose); pad only if S % (tile_r*128) != 0 ----
    x = x_nchw.reshape(B, C, S)
    if Sp != S:
        # TODO(synk): ragged tails cost one extra XLA pad + slice pass; arrange
        # H*W % 128 == 0 (true for the demo) to keep the wrapper copy-free.
        x = jnp.pad(x, ((0, 0), (0, 0), (0, Sp - S)))
    x = x.reshape(B, C, R, LANE)

    # Flattened weight (row-major [c, k]) + bias, resident in SMEM as scalars.
    wb = jnp.concatenate([weight.reshape(-1), bias.reshape(-1)]).astype(jnp.float32)

    # ---- VMEM budget: real per-block footprint, double-buffered, + slack ----
    in_item = jnp.dtype(x.dtype).itemsize
    out_item = jnp.dtype(out_dtype).itemsize
    n_out = 2 if compute_alpha else 1
    blk_bytes = tile_r * LANE * (C * in_item + n_out * n_cls * out_item)
    vmem_limit = int(min(48 * 1024 * 1024,
                         max(2 * blk_bytes + (2 << 20), 8 << 20)))

    kernel = functools.partial(
        _tmsu_kernel, n_in=C, n_cls=n_cls, with_alpha=compute_alpha
    )

    out_blk = pl.BlockSpec((None, n_cls, tile_r, LANE), lambda b, j: (b, 0, j, 0))
    out_shapes = [jax.ShapeDtypeStruct((B, n_cls, R, LANE), out_dtype)] * n_out
    out_specs = [out_blk] * n_out

    outs = pl.pallas_call(
        kernel,
        out_shape=tuple(out_shapes),
        grid_spec=pltpu.PrefetchScalarGridSpec(
            num_scalar_prefetch=0,
            grid=(B, n_row_tiles),
            in_specs=[
                # 20 scalars of weights/bias: SMEM, not per-step VMEM tiles.
                pl.BlockSpec(memory_space=pltpu.MemorySpace.SMEM),
                # (batch, channels, row-tile, 128); batch dim squeezed in-kernel.
                pl.BlockSpec((None, C, tile_r, LANE), lambda b, j: (b, 0, j, 0)),
            ],
            out_specs=out_specs,
        ),
        compiler_params=pltpu.CompilerParams(
            dimension_semantics=("parallel", "parallel"),
            vmem_limit_bytes=vmem_limit,
        ),
    )(wb, x)

    def _unflatten(y):
        if Sp == S:
            return y.reshape(B, n_cls, H, W)
        return y.reshape(B, n_cls, Sp)[:, :, :S].reshape(B, n_cls, H, W)

    if compute_alpha:
        ev, alpha = outs
        return _unflatten(ev), _unflatten(alpha)
    (ev,) = outs
    return _unflatten(ev)


def _reference_forward(x_nchw, weight, bias):
    """Pure-JAX reference of the same semantics (NCHW in / NCHW out)."""
    logits = jnp.einsum("bchw,ck->bkhw", x_nchw, weight) + bias[None, :, None, None]
    evidence = jax.nn.softplus(logits)
    return evidence, evidence + 1.0


if __name__ == "__main__":
    # Small shapes consistent with TMSU(model='U', input_dims='four'):
    # in_channels = 4 (four modalities), classes = 4.
    B, C_in, H, W = 2, 4, 16, 16
    classes = 4

    key = jax.random.PRNGKey(0)
    kx, kw, kb = jax.random.split(key, 3)

    x = jax.random.normal(kx, (B, C_in, H, W), dtype=jnp.float32)
    # Deterministic "backbone" parameters (1x1-conv stand-in).
    weight = jax.random.normal(kw, (C_in, classes), dtype=jnp.float32) * 0.1
    bias = jax.random.normal(kb, (classes,), dtype=jnp.float32) * 0.1

    evidence, alpha = tmsu_forward(x, weight, bias)
    evidence = jax.block_until_ready(evidence)
    alpha = jax.block_until_ready(alpha)

    ev_ref, alpha_ref = _reference_forward(x, weight, bias)
    assert evidence.shape == (B, classes, H, W)
    assert alpha.shape == (B, classes, H, W)
    assert jnp.allclose(evidence, ev_ref, atol=1e-5, rtol=1e-5)
    assert jnp.allclose(alpha, alpha_ref, atol=1e-5, rtol=1e-5)

    # Evidence-only path (what TMSU.forward returns at inference).
    ev_only = jax.block_until_ready(tmsu_forward(x, weight, bias, compute_alpha=False))
    assert jnp.allclose(ev_only, ev_ref, atol=1e-5, rtol=1e-5)

    print("KERNEL_OK")
</pallas_src>

<mosaic_0001>
module attributes {stable_mosaic.version = 11 : i64} {
  func.func @_tmsu_kernel(%arg0: i32, %arg1: i32, %arg2: memref<20xf32, #tpu.memory_space<smem>>, %arg3: memref<1x4x2x128xf32, #tpu.memory_space<vmem>>, %arg4: memref<1x4x2x128xf32, #tpu.memory_space<vmem>>, %arg5: memref<1x4x2x128xf32, #tpu.memory_space<vmem>>) attributes {dimension_semantics = [#tpu.dimension_semantics<parallel>, #tpu.dimension_semantics<parallel>], iteration_bounds = array<i64: 2, 1>, scalar_prefetch = 0 : i64, scratch_operands = 0 : i64, tpu.core_type = #tpu.core_type<tc>, window_params = [{transform_indices = @transform_0, window_bounds = array<i64: 20>}, {transform_indices = @transform_1, window_bounds = array<i64: 1, 4, 2, 128>}, {transform_indices = @transform_2, window_bounds = array<i64: 1, 4, 2, 128>}, {transform_indices = @transform_3, window_bounds = array<i64: 1, 4, 2, 128>}]} {
    %c0 = arith.constant 0 : index
    %c0_0 = arith.constant 0 : index
    %c0_1 = arith.constant 0 : index
    %c0_2 = arith.constant 0 : index
    %0 = vector.load %arg3[%c0, %c0_0, %c0_1, %c0_2] : memref<1x4x2x128xf32, #tpu.memory_space<vmem>>, vector<1x1x2x128xf32>
    %1 = vector.shape_cast %0 : vector<1x1x2x128xf32> to vector<2x128xf32>
    %c0_3 = arith.constant 0 : index
    %c1 = arith.constant 1 : index
    %c0_4 = arith.constant 0 : index
    %c0_5 = arith.constant 0 : index
    %2 = vector.load %arg3[%c0_3, %c1, %c0_4, %c0_5] : memref<1x4x2x128xf32, #tpu.memory_space<vmem>>, vector<1x1x2x128xf32>
    %3 = vector.shape_cast %2 : vector<1x1x2x128xf32> to vector<2x128xf32>
    %c0_6 = arith.constant 0 : index
    %c2 = arith.constant 2 : index
    %c0_7 = arith.constant 0 : index
    %c0_8 = arith.constant 0 : index
    %4 = vector.load %arg3[%c0_6, %c2, %c0_7, %c0_8] : memref<1x4x2x128xf32, #tpu.memory_space<vmem>>, vector<1x1x2x128xf32>
    %5 = vector.shape_cast %4 : vector<1x1x2x128xf32> to vector<2x128xf32>
    %c0_9 = arith.constant 0 : index
    %c3 = arith.constant 3 : index
    %c0_10 = arith.constant 0 : index
    %c0_11 = arith.constant 0 : index
    %6 = vector.load %arg3[%c0_9, %c3, %c0_10, %c0_11] : memref<1x4x2x128xf32, #tpu.memory_space<vmem>>, vector<1x1x2x128xf32>
    %7 = vector.shape_cast %6 : vector<1x1x2x128xf32> to vector<2x128xf32>
    %c0_12 = arith.constant 0 : index
    %8 = memref.load %arg2[%c0_12] : memref<20xf32, #tpu.memory_space<smem>>
    %9 = vector.broadcast %8 : f32 to vector<2x128xf32>
    %10 = arith.mulf %1, %9 : vector<2x128xf32>
    %c4 = arith.constant 4 : index
    %11 = memref.load %arg2[%c4] : memref<20xf32, #tpu.memory_space<smem>>
    %12 = vector.broadcast %11 : f32 to vector<2x128xf32>
    %13 = arith.mulf %3, %12 : vector<2x128xf32>
    %14 = arith.addf %10, %13 : vector<2x128xf32>
    %c8 = arith.constant 8 : index
    %15 = memref.load %arg2[%c8] : memref<20xf32, #tpu.memory_space<smem>>
    %16 = vector.broadcast %15 : f32 to vector<2x128xf32>
    %17 = arith.mulf %5, %16 : vector<2x128xf32>
    %18 = arith.addf %14, %17 : vector<2x128xf32>
    %c12 = arith.constant 12 : index
    %19 = memref.load %arg2[%c12] : memref<20xf32, #tpu.memory_space<smem>>
    %20 = vector.broadcast %19 : f32 to vector<2x128xf32>
    %21 = arith.mulf %7, %20 : vector<2x128xf32>
    %22 = arith.addf %18, %21 : vector<2x128xf32>
    %c16 = arith.constant 16 : index
    %23 = memref.load %arg2[%c16] : memref<20xf32, #tpu.memory_space<smem>>
    %24 = vector.broadcast %23 : f32 to vector<2x128xf32>
    %25 = arith.addf %22, %24 : vector<2x128xf32>
    %cst = arith.constant 0.000000e+00 : f32
    %26 = vector.broadcast %cst : f32 to vector<2x128xf32>
    %27 = arith.maximumf %25, %26 : vector<2x128xf32>
    %28 = math.absf %25 : vector<2x128xf32>
    %cst_13 = arith.constant 0.000000e+00 : f32
    %29 = vector.broadcast %cst_13 : f32 to vector<2x128xf32>
    %30 = arith.subf %29, %28 : vector<2x128xf32>
    %31 = math.exp %30 : vector<2x128xf32>
    %32 = math.log1p %31 : vector<2x128xf32>
    %33 = arith.addf %27, %32 : vector<2x128xf32>
    %c0_14 = arith.constant 0 : index
    %c0_15 = arith.constant 0 : index
    %c0_16 = arith.constant 0 : index
    %c0_17 = arith.constant 0 : index
    %34 = vector.load %arg4[%c0_14, %c0_15, %c0_16, %c0_17] : memref<1x4x2x128xf32, #tpu.memory_space<vmem>>, vector<1x1x2x128xf32>
    %35 = vector.shape_cast %34 : vector<1x1x2x128xf32> to vector<2x128xf32>
    %36 = vector.shape_cast %33 : vector<2x128xf32> to vector<1x1x2x128xf32>
    tpu.vector_store %arg4[%c0_14, %c0_15, %c0_16, %c0_17], %36 {strides = array<i32>} : memref<1x4x2x128xf32, #tpu.memory_space<vmem>>, vector<1x1x2x128xf32>,
    %cst_18 = arith.constant 1.000000e+00 : f32
    %37 = vector.broadcast %cst_18 : f32 to vector<2x128xf32>
    %38 = arith.addf %33, %37 : vector<2x128xf32>
    %c0_19 = arith.constant 0 : index
    %c0_20 = arith.constant 0 : index
    %c0_21 = arith.constant 0 : index
    %c0_22 = arith.constant 0 : index
    %39 = vector.load %arg5[%c0_19, %c0_20, %c0_21, %c0_22] : memref<1x4x2x128xf32, #tpu.memory_space<vmem>>, vector<1x1x2x128xf32>
    %40 = vector.shape_cast %39 : vector<1x1x2x128xf32> to vector<2x128xf32>
    %41 = vector.shape_cast %38 : vector<2x128xf32> to vector<1x1x2x128xf32>
    tpu.vector_store %arg5[%c0_19, %c0_20, %c0_21, %c0_22], %41 {strides = array<i32>} : memref<1x4x2x128xf32, #tpu.memory_space<vmem>>, vector<1x1x2x128xf32>,
    %c1_23 = arith.constant 1 : index
    %42 = memref.load %arg2[%c1_23] : memref<20xf32, #tpu.memory_space<smem>>
    %43 = vector.broadcast %42 : f32 to vector<2x128xf32>
    %44 = arith.mulf %1, %43 : vector<2x128xf32>
    %c5 = arith.constant 5 : index
    %45 = memref.load %arg2[%c5] : memref<20xf32, #tpu.memory_space<smem>>
    %46 = vector.broadcast %45 : f32 to vector<2x128xf32>
    %47 = arith.mulf %3, %46 : vector<2x128xf32>
    %48 = arith.addf %44, %47 : vector<2x128xf32>
    %c9 = arith.constant 9 : index
    %49 = memref.load %arg2[%c9] : memref<20xf32, #tpu.memory_space<smem>>
    %50 = vector.broadcast %49 : f32 to vector<2x128xf32>
    %51 = arith.mulf %5, %50 : vector<2x128xf32>
    %52 = arith.addf %48, %51 : vector<2x128xf32>
    %c13 = arith.constant 13 : index
    %53 = memref.load %arg2[%c13] : memref<20xf32, #tpu.memory_space<smem>>
    %54 = vector.broadcast %53 : f32 to vector<2x128xf32>
    %55 = arith.mulf %7, %54 : vector<2x128xf32>
    %56 = arith.addf %52, %55 : vector<2x128xf32>
    %c17 = arith.constant 17 : index
    %57 = memref.load %arg2[%c17] : memref<20xf32, #tpu.memory_space<smem>>
    %58 = vector.broadcast %57 : f32 to vector<2x128xf32>
    %59 = arith.addf %56, %58 : vector<2x128xf32>
    %cst_24 = arith.constant 0.000000e+00 : f32
    %60 = vector.broadcast %cst_24 : f32 to vector<2x128xf32>
    %61 = arith.maximumf %59, %60 : vector<2x128xf32>
    %62 = math.absf %59 : vector<2x128xf32>
    %cst_25 = arith.constant 0.000000e+00 : f32
    %63 = vector.broadcast %cst_25 : f32 to vector<2x128xf32>
    %64 = arith.subf %63, %62 : vector<2x128xf32>
    %65 = math.exp %64 : vector<2x128xf32>
    %66 = math.log1p %65 : vector<2x128xf32>
    %67 = arith.addf %61, %66 : vector<2x128xf32>
    %c0_26 = arith.constant 0 : index
    %c1_27 = arith.constant 1 : index
    %c0_28 = arith.constant 0 : index
    %c0_29 = arith.constant 0 : index
    %68 = vector.load %arg4[%c0_26, %c1_27, %c0_28, %c0_29] : memref<1x4x2x128xf32, #tpu.memory_space<vmem>>, vector<1x1x2x128xf32>
    %69 = vector.shape_cast %68 : vector<1x1x2x128xf32> to vector<2x128xf32>
    %70 = vector.shape_cast %67 : vector<2x128xf32> to vector<1x1x2x128xf32>
    tpu.vector_store %arg4[%c0_26, %c1_27, %c0_28, %c0_29], %70 {strides = array<i32>} : memref<1x4x2x128xf32, #tpu.memory_space<vmem>>, vector<1x1x2x128xf32>,
    %cst_30 = arith.constant 1.000000e+00 : f32
    %71 = vector.broadcast %cst_30 : f32 to vector<2x128xf32>
    %72 = arith.addf %67, %71 : vector<2x128xf32>
    %c0_31 = arith.constant 0 : index
    %c1_32 = arith.constant 1 : index
    %c0_33 = arith.constant 0 : index
    %c0_34 = arith.constant 0 : index
    %73 = vector.load %arg5[%c0_31, %c1_32, %c0_33, %c0_34] : memref<1x4x2x128xf32, #tpu.memory_space<vmem>>, vector<1x1x2x128xf32>
    %74 = vector.shape_cast %73 : vector<1x1x2x128xf32> to vector<2x128xf32>
    %75 = vector.shape_cast %72 : vector<2x128xf32> to vector<1x1x2x128xf32>
    tpu.vector_store %arg5[%c0_31, %c1_32, %c0_33, %c0_34], %75 {strides = array<i32>} : memref<1x4x2x128xf32, #tpu.memory_space<vmem>>, vector<1x1x2x128xf32>,
    %c2_35 = arith.constant 2 : index
    %76 = memref.load %arg2[%c2_35] : memref<20xf32, #tpu.memory_space<smem>>
    %77 = vector.broadcast %76 : f32 to vector<2x128xf32>
    %78 = arith.mulf %1, %77 : vector<2x128xf32>
    %c6 = arith.constant 6 : index
    %79 = memref.load %arg2[%c6] : memref<20xf32, #tpu.memory_space<smem>>
    %80 = vector.broadcast %79 : f32 to vector<2x128xf32>
    %81 = arith.mulf %3, %80 : vector<2x128xf32>
    %82 = arith.addf %78, %81 : vector<2x128xf32>
    %c10 = arith.constant 10 : index
    %83 = memref.load %arg2[%c10] : memref<20xf32, #tpu.memory_space<smem>>
    %84 = vector.broadcast %83 : f32 to vector<2x128xf32>
    %85 = arith.mulf %5, %84 : vector<2x128xf32>
    %86 = arith.addf %82, %85 : vector<2x128xf32>
    %c14 = arith.constant 14 : index
    %87 = memref.load %arg2[%c14] : memref<20xf32, #tpu.memory_space<smem>>
    %88 = vector.broadcast %87 : f32 to vector<2x128xf32>
    %89 = arith.mulf %7, %88 : vector<2x128xf32>
    %90 = arith.addf %86, %89 : vector<2x128xf32>
    %c18 = arith.constant 18 : index
    %91 = memref.load %arg2[%c18] : memref<20xf32, #tpu.memory_space<smem>>
    %92 = vector.broadcast %91 : f32 to vector<2x128xf32>
    %93 = arith.addf %90, %92 : vector<2x128xf32>
    %cst_36 = arith.constant 0.000000e+00 : f32
    %94 = vector.broadcast %cst_36 : f32 to vector<2x128xf32>
    %95 = arith.maximumf %93, %94 : vector<2x128xf32>
    %96 = math.absf %93 : vector<2x128xf32>
    %cst_37 = arith.constant 0.000000e+00 : f32
    %97 = vector.broadcast %cst_37 : f32 to vector<2x128xf32>
    %98 = arith.subf %97, %96 : vector<2x128xf32>
    %99 = math.exp %98 : vector<2x128xf32>
    %100 = math.log1p %99 : vector<2x128xf32>
    %101 = arith.addf %95, %100 : vector<2x128xf32>
    %c0_38 = arith.constant 0 : index
    %c2_39 = arith.constant 2 : index
    %c0_40 = arith.constant 0 : index
    %c0_41 = arith.constant 0 : index
    %102 = vector.load %arg4[%c0_38, %c2_39, %c0_40, %c0_41] : memref<1x4x2x128xf32, #tpu.memory_space<vmem>>, vector<1x1x2x128xf32>
    %103 = vector.shape_cast %102 : vector<1x1x2x128xf32> to vector<2x128xf32>
    %104 = vector.shape_cast %101 : vector<2x128xf32> to vector<1x1x2x128xf32>
    tpu.vector_store %arg4[%c0_38, %c2_39, %c0_40, %c0_41], %104 {strides = array<i32>} : memref<1x4x2x128xf32, #tpu.memory_space<vmem>>, vector<1x1x2x128xf32>,
    %cst_42 = arith.constant 1.000000e+00 : f32
    %105 = vector.broadcast %cst_42 : f32 to vector<2x128xf32>
    %106 = arith.addf %101, %105 : vector<2x128xf32>
    %c0_43 = arith.constant 0 : index
    %c2_44 = arith.constant 2 : index
    %c0_45 = arith.constant 0 : index
    %c0_46 = arith.constant 0 : index
    %107 = vector.load %arg5[%c0_43, %c2_44, %c0_45, %c0_46] : memref<1x4x2x128xf32, #tpu.memory_space<vmem>>, vector<1x1x2x128xf32>
    %108 = vector.shape_cast %107 : vector<1x1x2x128xf32> to vector<2x128xf32>
    %109 = vector.shape_cast %106 : vector<2x128xf32> to vector<1x1x2x128xf32>
    tpu.vector_store %arg5[%c0_43, %c2_44, %c0_45, %c0_46], %109 {strides = array<i32>} : memref<1x4x2x128xf32, #tpu.memory_space<vmem>>, vector<1x1x2x128xf32>,
    %c3_47 = arith.constant 3 : index
    %110 = memref.load %arg2[%c3_47] : memref<20xf32, #tpu.memory_space<smem>>
    %111 = vector.broadcast %110 : f32 to vector<2x128xf32>
    %112 = arith.mulf %1, %111 : vector<2x128xf32>
    %c7 = arith.constant 7 : index
    %113 = memref.load %arg2[%c7] : memref<20xf32, #tpu.memory_space<smem>>
    %114 = vector.broadcast %113 : f32 to vector<2x128xf32>
    %115 = arith.mulf %3, %114 : vector<2x128xf32>
    %116 = arith.addf %112, %115 : vector<2x128xf32>
    %c11 = arith.constant 11 : index
    %117 = memref.load %arg2[%c11] : memref<20xf32, #tpu.memory_space<smem>>
    %118 = vector.broadcast %117 : f32 to vector<2x128xf32>
    %119 = arith.mulf %5, %118 : vector<2x128xf32>
    %120 = arith.addf %116, %119 : vector<2x128xf32>
    %c15 = arith.constant 15 : index
    %121 = memref.load %arg2[%c15] : memref<20xf32, #tpu.memory_space<smem>>
    %122 = vector.broadcast %121 : f32 to vector<2x128xf32>
    %123 = arith.mulf %7, %122 : vector<2x128xf32>
    %124 = arith.addf %120, %123 : vector<2x128xf32>
    %c19 = arith.constant 19 : index
    %125 = memref.load %arg2[%c19] : memref<20xf32, #tpu.memory_space<smem>>
    %126 = vector.broadcast %125 : f32 to vector<2x128xf32>
    %127 = arith.addf %124, %126 : vector<2x128xf32>
    %cst_48 = arith.constant 0.000000e+00 : f32
    %128 = vector.broadcast %cst_48 : f32 to vector<2x128xf32>
    %129 = arith.maximumf %127, %128 : vector<2x128xf32>
    %130 = math.absf %127 : vector<2x128xf32>
    %cst_49 = arith.constant 0.000000e+00 : f32
    %131 = vector.broadcast %cst_49 : f32 to vector<2x128xf32>
    %132 = arith.subf %131, %130 : vector<2x128xf32>
    %133 = math.exp %132 : vector<2x128xf32>
    %134 = math.log1p %133 : vector<2x128xf32>
    %135 = arith.addf %129, %134 : vector<2x128xf32>
    %c0_50 = arith.constant 0 : index
    %c3_51 = arith.constant 3 : index
    %c0_52 = arith.constant 0 : index
    %c0_53 = arith.constant 0 : index
    %136 = vector.load %arg4[%c0_50, %c3_51, %c0_52, %c0_53] : memref<1x4x2x128xf32, #tpu.memory_space<vmem>>, vector<1x1x2x128xf32>
    %137 = vector.shape_cast %136 : vector<1x1x2x128xf32> to vector<2x128xf32>
    %138 = vector.shape_cast %135 : vector<2x128xf32> to vector<1x1x2x128xf32>
    tpu.vector_store %arg4[%c0_50, %c3_51, %c0_52, %c0_53], %138 {strides = array<i32>} : memref<1x4x2x128xf32, #tpu.memory_space<vmem>>, vector<1x1x2x128xf32>,
    %cst_54 = arith.constant 1.000000e+00 : f32
    %139 = vector.broadcast %cst_54 : f32 to vector<2x128xf32>
    %140 = arith.addf %135, %139 : vector<2x128xf32>
    %c0_55 = arith.constant 0 : index
    %c3_56 = arith.constant 3 : index
    %c0_57 = arith.constant 0 : index
    %c0_58 = arith.constant 0 : index
    %141 = vector.load %arg5[%c0_55, %c3_56, %c0_57, %c0_58] : memref<1x4x2x128xf32, #tpu.memory_space<vmem>>, vector<1x1x2x128xf32>
    %142 = vector.shape_cast %141 : vector<1x1x2x128xf32> to vector<2x128xf32>
    %143 = vector.shape_cast %140 : vector<2x128xf32> to vector<1x1x2x128xf32>
    tpu.vector_store %arg5[%c0_55, %c3_56, %c0_57, %c0_58], %143 {strides = array<i32>} : memref<1x4x2x128xf32, #tpu.memory_space<vmem>>, vector<1x1x2x128xf32>,
    return
  }
  func.func @transform_0(%arg0: i32, %arg1: i32) -> i32 {
    %c0_i32 = arith.constant 0 : i32
    %c0_i32_0 = arith.constant 0 : i32
    return %c0_i32 : i32
  }
  func.func @transform_1(%arg0: i32, %arg1: i32) -> (i32, i32, i32, i32) {
    %c0_i32 = arith.constant 0 : i32
    %c0_i32_0 = arith.constant 0 : i32
    %c0_i32_1 = arith.constant 0 : i32
    return %arg0, %c0_i32, %arg1, %c0_i32_0 : i32, i32, i32, i32
  }
  func.func @transform_2(%arg0: i32, %arg1: i32) -> (i32, i32, i32, i32) {
    %c0_i32 = arith.constant 0 : i32
    %c0_i32_0 = arith.constant 0 : i32
    %c0_i32_1 = arith.constant 0 : i32
    return %arg0, %c0_i32, %arg1, %c0_i32_0 : i32, i32, i32, i32
  }
  func.func @transform_3(%arg0: i32, %arg1: i32) -> (i32, i32, i32, i32) {
    %c0_i32 = arith.constant 0 : i32
    %c0_i32_0 = arith.constant 0 : i32
    %c0_i32_1 = arith.constant 0 : i32
    return %arg0, %c0_i32, %arg1, %c0_i32_0 : i32, i32, i32, i32
  }
}

</mosaic_0001>

<bundles_post_ra>
// kernel: tmsu_forward.1
= control target key start
LH: loop header
LB: loop body
LE: loop exit
PB: predicated region body
PF: predicated region fallthrough
CT: control target
= control target key end

     0   :  { %9 = vsyncpa [#allocation3], 0  ;;  %s698_s12 = smov 0   ;;  %s700_s13 = smov 0   ;;  %s823_s0 = inlined_call_operand.vmem [shape: f32[20], index: 0, kind: input, shape index: {}]   ;;  %s824_s1 = inlined_call_operand.vmem [shape: f32[2,4,2,128], index: 1, kind: input, shape index: {}]   ;;  %s825_s2 = inlined_call_operand.vmem [shape: f32[2,4,2,128], index: 2, kind: output, shape index: {0}]   ;;  %s826_s3 = inlined_call_operand.vmem [shape: f32[2,4,2,128], index: 3, kind: output, shape index: {1}]  }
   0x1   :  { %s702_s14 = smov 0  }
   0x2 LB: > { %s537_s15 = sadd.s32 4294967295, %s675_s14   ;;  %s27_s16 = sadd.s32 1, %s671_s13  ;;  %s675_s14 = sphi %s702_s14, %s15_s14   ;;  %s671_s13 = sphi %s700_s13, %s830_s13   ;;  %s667_s12 = sphi %s698_s12, %s829_s12  }
   0x3   : > { %p29_p0 = scmp.ge.s32.totalorder %s27_s16, 2  ;;  %p539_p1 = scmp.ge.s32.totalorder %s675_s14, 1 }
   0x4   : > { %p137_p2 = scmp.lt.s32.totalorder %s675_s14, 3  ;;  %p723_p4 = scmp.eq.s32.totalorder %s537_s15, 0 }
   0x5   : > { %s832_s16 = smov (%p29_p0, %s27_s16), 0  ;;  %s150_s21 = sshll.u32 %s823_s0, 4  ;;  %s151_s21 = int_to_ptr.vmem [resolvable:$true] %s150_s21 }
   0x6   : > { %p719_p3 = pnand %p539_p1, %p137_p2  ;;  %s634_s22 = scalar_lea.vmem %s151_s21, 16 }
   0x7   : > { %p635_p7 = scmp.ne.s32.totalorder %s151_s21, %s634_s22  ;;  %p642_p11 = scmp.lt.s32.totalorder %s151_s21, %s151_s21 }
   0x8   : > { %p587_p5 = pneg %p719_p3  ;;  %p643_p12 = scmp.lt.s32.totalorder %s634_s22, %s634_s22 }
   0xa   : > { %p588_p6 = pnand %p723_p4, %p587_p5  ;;  %p644_p13 = por %p643_p12, %p642_p11 }
   0xc   : > { %p636_p8 = pneg %p588_p6 }
   0xe   : > { %p637_p9 = pnand %p636_p8, %p635_p7 }
  0x10   : > { %p638_p10 = pneg %p637_p9 }
  0x12   : > { %p645_p0 = pnand %p644_p13, %p638_p10 }
  0x14   : > { %648 = shalt.err (!%p645_p0)
}
  0x15   : > { %s677_s23 = smov [#allocation2]   ;;  %174 = sbr.rel (%p719_p3) target bundleno = 98 (0x62), region = 28 }
  0x16   : > { %590 = dma.vmem_to_smem (!%p588_p6), %s151_s21, 16, %s677_s23, [#allocation3]  }
  0x1c   : > { %662 = dma.done.wait (%p723_p4), [#allocation3], 16  }
  0x1d   : > { %664 = vsyncadd (%p723_p4), [#allocation3], 4294967280 }
  0x1e   : > { %180 = sfence }
  0x1f   : > { %p213_p1 = scmp.lt.s32.totalorder %s667_s12, 1  ;;  %s244_s24 = sld [smem:[#allocation2]] }
  0x20   : > { %s553_s25 = sld [smem:[#allocation2 + $0x4]]  ;;  %s554_s26 = sld [smem:[#allocation2 + $0x8]] }
  0x21   : > { %s834_s12 = smov (!%p213_p1, %s667_s12), 1  ;;  %s555_s27 = sld [smem:[#allocation2 + $0xc]] }
  0x22   : > { %s742_s28 = sshll.u32 %s834_s12, 3  ;;  %s557_s29 = sld [smem:[#allocation2 + $0x1]] }
  0x23   : > { %s220_s5 = scalar_lea.vmem %s824_s1, %s742_s28  ;;  %s748_s6 = sld [smem:[#allocation2 + $0x10]] }
  0x24   : > { %v237_v0 = vld [vmem:[%s220_s5] sm:$0x3]  ;;  %v550_v1 = vld [vmem:[%s220_s5 + $0x2] sm:$0x3]  ;;  %v551_v2 = vld [vmem:[%s220_s5 + $0x4] sm:$0x3]  ;;  %s801_s30 = scalar_lea.vmem %s826_s3, %s742_s28 }
  0x25   : > { %v245_v3 = vstv %s244_s24  ;;  %v552_v4 = vld [vmem:[%s220_s5 + $0x6] sm:$0x3]  ;;  %s558_s7 = sld [smem:[#allocation2 + $0x5]]  ;;  %s559_s8 = sld [smem:[#allocation2 + $0x9]] }
  0x26   : > { %v246_v5 = vmul.f32 %v245_v3, %v237_v0  ;;  %v248_v6 = vstv %s553_s25  ;;  %v252_v7 = vstv %s554_s26  ;;  %s560_s9 = sld [smem:[#allocation2 + $0xd]]  ;;  %s750_s10 = sld [smem:[#allocation2 + $0x11]] }
  0x27   : > { %v249_v8 = vmul.f32 %v550_v1, %v248_v6  ;;  %v253_v9 = vmul.f32 %v551_v2, %v252_v7  ;;  %v256_v10 = vstv %s555_s27  ;;  %s564_s11 = sld [smem:[#allocation2 + $0x2]]  ;;  %s565_s12 = sld [smem:[#allocation2 + $0x6]] }
  0x28   : > { %v257_v12 = vmul.f32 %v552_v4, %v256_v10  ;;  %v281_v13 = vstv %s557_s29  ;;  %s752_s15 = sld [smem:[#allocation2 + $0xa]]  ;;  %s754_s17 = sld [smem:[#allocation2 + $0xe]] }
  0x29   : > { %v250_v11 = vadd.f32 %v249_v8, %v246_v5  ;;  %s756_s18 = sld [smem:[#allocation2 + $0x3]]  ;;  %v282_v15 = vmul.f32 %v281_v13, %v237_v0  ;;  %s758_s19 = sld [smem:[#allocation2 + $0x7]]  ;;  %v260_v16 = vstv %s748_s6 }
  0x2a   : > { %s760_s20 = sld [smem:[#allocation2 + $0xb]]  ;;  %s763_s21 = sld [smem:[#allocation2 + $0x12]] }
  0x2b   : > { %v254_v14 = vadd.f32 %v253_v9, %v250_v11  ;;  %v284_v17 = vstv %s558_s7  ;;  %v288_v18 = vstv %s559_s8  ;;  %s765_s22 = sld [smem:[#allocation2 + $0xf]]  ;;  %s772_s23 = sld [smem:[#allocation2 + $0x13]] }
  0x2c   : > { %v285_v20 = vmul.f32 %v550_v1, %v284_v17  ;;  %v289_v21 = vmul.f32 %v551_v2, %v288_v18  ;;  %v292_v22 = vstv %s560_s9  ;;  %v296_v35 = vstv %s750_s10  ;;  %s795_s26 = scalar_lea.vmem %s825_s2, %s742_s28 }
  0x2d   : > { %v258_v19 = vadd.f32 %v257_v12, %v254_v14  ;;  %v293_v23 = vmul.f32 %v552_v4, %v292_v22  ;;  %v319_v24 = vstv %s564_s11  ;;  %v322_v25 = vstv %s565_s12 }
  0x2e   : > { %v286_v27 = vadd.f32 %v285_v20, %v282_v15  ;;  %v320_v28 = vmul.f32 %v319_v24, %v237_v0  ;;  %v323_v29 = vmul.f32 %v550_v1, %v322_v25  ;;  %v326_v30 = vstv %s752_s15 }
  0x2f   : > { %v767_v26 = vadd.f32 %v260_v16, %v258_v19  ;;  %v330_v31 = vstv %s754_s17  ;;  %v357_v32 = vstv %s756_s18  ;;  %v327_v37 = vmul.f32 %v551_v2, %v326_v30 }
  0x30   : > { %v290_v34 = vadd.f32 %v289_v21, %v286_v27  ;;  %v324_v36 = vadd.f32 %v323_v29, %v320_v28  ;;  %v331_v38 = vmul.f32 %v552_v4, %v330_v31  ;;  %v358_v39 = vmul.f32 %v357_v32, %v237_v0 }
  0x31   : > { %v263_v33 = vand.u32 2147483647, %v767_v26  ;;  %v360_v40 = vstv %s758_s19  ;;  %v364_v44 = vstv %s760_s20  ;;  %v334_v46 = vstv %s763_s21 }
  0x32   : > { %v294_v42 = vadd.f32 %v293_v23, %v290_v34  ;;  %v361_v43 = vmul.f32 %v550_v1, %v360_v40  ;;  %v328_v45 = vadd.f32 %v327_v37, %v324_v36  ;;  %v365_v47 = vmul.f32 %v551_v2, %v364_v44 }
  0x33   : > { %v264_v41 = vsub.f32 0.0, %v263_v33  ;;  %v368_v48 = vstv %s765_s22  ;;  %v372_v57 = vstv %s772_s23  ;;  %v262_v17 = vmax.f32 %v767_v26, 0.0 }
  0x34   : > { %v780_v50 = vadd.f32 %v296_v35, %v294_v42  ;;  %v362_v51 = vadd.f32 %v361_v43, %v358_v39  ;;  %v369_v52 = vmul.f32 %v552_v4, %v368_v48  ;;  %v332_v53 = vadd.f32 %v331_v38, %v328_v45 }
  0x35   : > { %v265_v49 = vmul.f32 1.442695, %v264_v41 }
  0x36   : > { %v299_v54 = vand.u32 2147483647, %v780_v50  ;;  %v366_v55 = vadd.f32 %v365_v47, %v362_v51  ;;  %v783_v56 = vadd.f32 %v334_v46, %v332_v53  ;;  %v298_v31 = vmax.f32 %v780_v50, 0.0 }
  0x37   : > { %618 = vpow2.f32 %v265_v49 }
  0x38   : > { %v300_v58 = vsub.f32 0.0, %v299_v54  ;;  %v370_v59 = vadd.f32 %v369_v52, %v366_v55  ;;  %v337_v60 = vand.u32 2147483647, %v783_v56  ;;  %v336_v38 = vmax.f32 %v783_v56, 0.0 }
  0x3a   : > { %v301_v61 = vmul.f32 1.442695, %v300_v58  ;;  %v787_v62 = vadd.f32 %v372_v57, %v370_v59  ;;  %v338_v63 = vsub.f32 0.0, %v337_v60 }
  0x3c   : > { %620 = vpow2.f32 %v301_v61  ;;  %v375_v0 = vand.u32 2147483647, %v787_v62  ;;  %v339_v1 = vmul.f32 1.442695, %v338_v63  ;;  %v374_v45 = vmax.f32 %v787_v62, 0.0 }
  0x3e   : > { %v376_v2 = vsub.f32 0.0, %v375_v0  ;;  %622 = vpow2.f32 %v339_v1 }
  0x40   : > { %v377_v4 = vmul.f32 1.442695, %v376_v2 }
  0x41   : > { %v619_v3 = vpop.eup %618 }
  0x42   : > { %v267_v5 = vadd.f32 1.0, %v619_v3  ;;  %624 = vpow2.f32 %v377_v4  ;;  %v270_v6 = vmul.f32 -0.5, %v619_v3  ;;  %v273_v11 = vand.u32 2147483647, %v619_v3 }
  0x44   : > { %626 = vlog2.f32 %v267_v5  ;;  %v271_v9 = vadd.f32 1.0, %v270_v6  ;;  %vm274_vm0 = vcmp.lt.f32.partialorder %v273_v11, 0.0004427343 }
  0x46   : > { %v621_v7 = vpop.eup %620  ;;  %v272_v15 = vmul.f32 %v619_v3, %v271_v9 }
  0x47   : > { %v303_v8 = vadd.f32 1.0, %v621_v7  ;;  %v306_v12 = vmul.f32 -0.5, %v621_v7  ;;  %v309_v22 = vand.u32 2147483647, %v621_v7 }
  0x48   : > { %v623_v10 = vpop.eup %622 }
  0x49   : > { %628 = vlog2.f32 %v303_v8  ;;  %v341_v13 = vadd.f32 1.0, %v623_v10  ;;  %v344_v18 = vmul.f32 -0.5, %v623_v10  ;;  %v307_v21 = vadd.f32 1.0, %v306_v12 }
  0x4a   : > { %v347_v28 = vand.u32 2147483647, %v623_v10  ;;  %vm310_vm1 = vcmp.lt.f32.partialorder %v309_v22, 0.0004427343 }
  0x4b   : > { %630 = vlog2.f32 %v341_v13  ;;  %v345_v27 = vadd.f32 1.0, %v344_v18  ;;  %v308_v26 = vmul.f32 %v621_v7, %v307_v21 }
  0x4c   : > { %v625_v14 = vpop.eup %624  ;;  %vm348_vm2 = vcmp.lt.f32.partialorder %v347_v28, 0.0004427343 }
  0x4d   : > { %v379_v19 = vadd.f32 1.0, %v625_v14  ;;  %v382_v24 = vmul.f32 -0.5, %v625_v14  ;;  %v346_v34 = vmul.f32 %v623_v10, %v345_v27  ;;  %v385_v35 = vand.u32 2147483647, %v625_v14 }
  0x4e   : > { %v627_v16 = vpop.eup %626 }
  0x4f   : > { %v269_v20 = vmul.f32 0.6931472, %v627_v16  ;;  %632 = vlog2.f32 %v379_v19  ;;  %v383_v33 = vadd.f32 1.0, %v382_v24  ;;  %vm386_vm3 = vcmp.lt.f32.partialorder %v385_v35, 0.0004427343 }
  0x51   : > { %v275_v23 = vsel %vm274_vm0, %v272_v15, %v269_v20  ;;  %v384_v41 = vmul.f32 %v625_v14, %v383_v33 }
  0x52   : > { %v276_v25 = vadd.f32 %v275_v23, %v262_v17 }
  0x53   : > { %v629_v29 = vpop.eup %628 }
  0x54   : > { %277 = vst [vmem:[%s795_s26] sm:$0x3] %v276_v25  ;;  %v278_v30 = vadd.f32 1.0, %v276_v25  ;;  %v305_v32 = vmul.f32 0.6931472, %v629_v29 }
  0x55   : > { %v631_v36 = vpop.eup %630 }
  0x56   : > { %279 = vst [vmem:[%s801_s30] sm:$0x3] %v278_v30  ;;  %v311_v37 = vsel %vm310_vm1, %v308_v26, %v305_v32  ;;  %v343_v40 = vmul.f32 0.6931472, %v631_v36 }
  0x57   : > { %v312_v39 = vadd.f32 %v311_v37, %v298_v31 }
  0x58   : > { %v349_v44 = vsel %vm348_vm2, %v346_v34, %v343_v40 }
  0x59   : > { %v633_v42 = vpop.eup %632  ;;  %562 = vst [vmem:[%s795_s26 + $0x2] sm:$0x3] %v312_v39  ;;  %v315_v43 = vadd.f32 1.0, %v312_v39  ;;  %v350_v46 = vadd.f32 %v349_v44, %v336_v38 }
  0x5a   : > { %v381_v47 = vmul.f32 0.6931472, %v633_v42 }
  0x5b   : > { %563 = vst [vmem:[%s801_s30 + $0x2] sm:$0x3] %v315_v43  ;;  %569 = vst [vmem:[%s795_s26 + $0x4] sm:$0x3] %v350_v46  ;;  %v353_v48 = vadd.f32 1.0, %v350_v46 }
  0x5c   : > { %v387_v49 = vsel %vm386_vm3, %v384_v41, %v381_v47 }
  0x5d   : > { %v388_v50 = vadd.f32 %v387_v49, %v374_v45  ;;  %570 = vst [vmem:[%s801_s30 + $0x4] sm:$0x3] %v353_v48 }
  0x5f   : > { %576 = vst [vmem:[%s795_s26 + $0x6] sm:$0x3] %v388_v50  ;;  %v391_v51 = vadd.f32 1.0, %v388_v50 }
  0x61   : > { %577 = vst [vmem:[%s801_s30 + $0x6] sm:$0x3] %v391_v51 }
  0x62 PF: > { %s15_s14 = sadd.s32 1, %s675_s14   ;;  %s829_s12 = smov %s671_s13 }
  0x63   : > { %p12_p2 = scmp.ge.s32.totalorder %s15_s14, 4   ;;  %s830_s13 = smov %s832_s16 }
  0x65   :  { %14 = sbr.rel (!%p12_p2) target bundleno = 2 (0x2), region = 84 }
  0x6c   :  { %443 = vsyncpa [#allocation3], 1 }
  0x6d   :  { %445 = vsyncpa [#allocation3 + $0x1], 1 }

</bundles_post_ra>
